<compile_context>
chip_gen: v7x
topology: tpu7x:2x2x1
jax: 0.10.0
libtpu: 0.0.40
codegen_flags: <defaults>
</compile_context>

<pallas_src>
import functools
import math

import jax
import jax.numpy as jnp
from jax import lax
from jax.experimental import pallas as pl
from jax.experimental.pallas import tpu as pltpu

_LANES = 128
_SUBLANES = 8


# ---------------------------------------------------------------------------
# Tiling helpers
# ---------------------------------------------------------------------------
def _vmem_limit_bytes():
    """Scoped-VMEM limit derived from the actual chip, v7x-safe fallback."""
    try:
        cap = int(pltpu.get_tpu_info().vmem_capacity_bytes)
    except Exception:
        cap = 64 * 1024 * 1024  # v7x has 64 MiB per TC; safe lower bound
    return min((cap * 3) // 4, 96 * 1024 * 1024)


def _target_block_bytes(vmem_limit):
    # ~8 MiB/block on v7x (48 MiB scoped limit), ~16 MiB on v5e/v6e (96 MiB).
    # Input + output blocks, each double-buffered, is 4x this -> fits the limit.
    return max(1 << 20, min(vmem_limit // 6, 16 * 1024 * 1024))


def _sublane_align(dtype):
    # (8,128) tiling for 4-byte dtypes, (16,128) for bf16, (32,128) for int8/fp8.
    return max(_SUBLANES, 32 // jnp.dtype(dtype).itemsize)


def _pick_tile(total, bytes_per_unit, vmem_limit, align, min_steps=8):
    """Tile (multiple of `align`, or the full extent) for one grid axis.

    Goals: (a) block fits the chip-dependent VMEM budget, (b) the grid has at
    least ~min_steps steps so DMA/compute overlap and (on v7x) both TensorCores
    get balanced work on a "parallel" axis, (c) dtype-legal sublane alignment.
    """
    if total <= align:
        return total  # full extent: always a legal block dim
    vmem_cap = max(
        align,
        ((_target_block_bytes(vmem_limit) // max(bytes_per_unit, 1)) // align) * align,
    )
    per_step = -(-total // min_steps)              # ceil(total / min_steps)
    step_cap = max(align, (per_step // align) * align)
    return min(vmem_cap, step_cap)


# ---------------------------------------------------------------------------
# Kernels
# ---------------------------------------------------------------------------
def _ln_rows_kernel(x_ref, w_ref, b_ref, o_ref, *, eps):
    # x_ref: (TR, C); normalize each row over the last (lane) axis.
    x = x_ref[...].astype(jnp.float32)
    mean = jnp.mean(x, axis=-1, keepdims=True)
    xc = x - mean
    var = jnp.mean(xc * xc, axis=-1, keepdims=True)  # biased variance (torch)
    y = xc * lax.rsqrt(var + eps)
    w = w_ref[...].astype(jnp.float32)  # (1, C), resident across the grid
    b = b_ref[...].astype(jnp.float32)
    o_ref[...] = (y * w + b).astype(o_ref.dtype)


def _ln_rows_packed_kernel(x_ref, ar_ref, ab_ref, w_ref, b_ref, o_ref, *, eps):
    # x_ref : (TR, 128) with G logical rows (of C channels each) packed per
    #         physical row, so loads/stores are lane-dense (no vst.msk).
    # ar_ref: (128, G) group-mean reducer (1/C within each group's lanes).
    # ab_ref: (G, 128) 0/1 broadcast matrix (repeat each group value C times).
    # Split reduce/broadcast keeps MXU flops ~C/2x lower than a (128,128)
    # block-diagonal matmul, and rsqrt runs on G lanes per row instead of 128.
    x = x_ref[...].astype(jnp.float32)
    ar = ar_ref[...]
    ab = ab_ref[...]
    mean_g = jnp.dot(x, ar, precision=lax.Precision.HIGHEST,
                     preferred_element_type=jnp.float32)            # (TR, G)
    mean = jnp.dot(mean_g, ab, precision=lax.Precision.HIGHEST,
                   preferred_element_type=jnp.float32)              # (TR, 128)
    xc = x - mean
    var_g = jnp.dot(xc * xc, ar, precision=lax.Precision.HIGHEST,
                    preferred_element_type=jnp.float32)             # (TR, G)
    inv_g = lax.rsqrt(var_g + eps)                                  # G rsqrts/row
    inv = jnp.dot(inv_g, ab, precision=lax.Precision.HIGHEST,
                  preferred_element_type=jnp.float32)               # (TR, 128)
    y = xc * inv
    w = w_ref[...].astype(jnp.float32)  # (1, 128): weight tiled G times, resident
    b = b_ref[...].astype(jnp.float32)
    o_ref[...] = (y * w + b).astype(o_ref.dtype)


def _ln_cf_lanes_kernel(x_ref, w_ref, b_ref, o_ref, *, eps):
    # x_ref: (1, C, TS, 128).  The spatial extent occupies full (sublane, lane)
    # tiles, so every vreg is fully packed even for tiny C; the reduction over
    # channels (axis 1) is just C full-vreg VPU adds.
    x = x_ref[...].astype(jnp.float32)
    mean = jnp.mean(x, axis=1, keepdims=True)
    xc = x - mean
    var = jnp.mean(xc * xc, axis=1, keepdims=True)  # biased variance (torch)
    y = xc * lax.rsqrt(var + eps)
    w = w_ref[...].astype(jnp.float32)  # (1, C, 1, 1), resident
    b = b_ref[...].astype(jnp.float32)
    o_ref[...] = (y * w + b).astype(o_ref.dtype)


def _ln_channels_first_kernel(x_ref, w_ref, b_ref, o_ref, *, eps):
    # Fallback layout: (1, C, T) block of NC(HW); reduce over C on sublanes,
    # lanes stay dense with the spatial extent.  Transpose-free.
    x = x_ref[...].astype(jnp.float32)
    mean = jnp.mean(x, axis=1, keepdims=True)
    xc = x - mean
    var = jnp.mean(xc * xc, axis=1, keepdims=True)
    y = xc * lax.rsqrt(var + eps)
    w = w_ref[...].astype(jnp.float32)  # (1, C, 1), resident
    b = b_ref[...].astype(jnp.float32)
    o_ref[...] = (y * w + b).astype(o_ref.dtype)


# ---------------------------------------------------------------------------
# channels_last wrappers
# ---------------------------------------------------------------------------
def _ln_last_general(x2, weight, bias, eps):
    R, C = x2.shape
    limit = _vmem_limit_bytes()
    esize = jnp.dtype(x2.dtype).itemsize
    align = _sublane_align(x2.dtype)
    tr = _pick_tile(R, C * esize, limit, align)
    w_row = weight.astype(jnp.float32).reshape(1, C)
    b_row = bias.astype(jnp.float32).reshape(1, C)
    return pl.pallas_call(
        functools.partial(_ln_rows_kernel, eps=eps),
        out_shape=jax.ShapeDtypeStruct((R, C), x2.dtype),
        grid_spec=pltpu.PrefetchScalarGridSpec(
            num_scalar_prefetch=0,
            grid=(pl.cdiv(R, tr),),
            in_specs=[
                pl.BlockSpec((tr, C), lambda i: (i, 0)),
                pl.BlockSpec((1, C), lambda i: (0, 0)),   # resident
                pl.BlockSpec((1, C), lambda i: (0, 0)),   # resident
            ],
            out_specs=pl.BlockSpec((tr, C), lambda i: (i, 0)),
        ),
        compiler_params=pltpu.CompilerParams(
            dimension_semantics=("parallel",),
            vmem_limit_bytes=limit),
        cost_estimate=pl.CostEstimate(
            flops=8 * R * C,
            transcendentals=R,
            bytes_accessed=2 * R * C * esize),
    )(x2, w_row, b_row)


def _ln_last_packed(x2, weight, bias, eps, G):
    R, C = x2.shape
    GC = G * C                      # == 128 by construction (gate below)
    Rp = R // G
    xp = x2.reshape(Rp, GC)         # free row-major reshape, no HBM copy
    limit = _vmem_limit_bytes()
    esize = jnp.dtype(x2.dtype).itemsize
    align = _sublane_align(x2.dtype)

    # Tiny resident matrices; built inside the jitted executable (constants).
    gid = jnp.arange(GC, dtype=jnp.int32) // C
    onehot = (gid[:, None] == jnp.arange(G, dtype=jnp.int32)[None, :])
    a_reduce = onehot.astype(jnp.float32) / float(C)   # (GC, G)
    a_bcast = onehot.T.astype(jnp.float32)             # (G, GC) exact 0/1
    w_row = jnp.tile(weight.astype(jnp.float32), G).reshape(1, GC)
    b_row = jnp.tile(bias.astype(jnp.float32), G).reshape(1, GC)

    tr = _pick_tile(Rp, GC * esize, limit, align)
    out = pl.pallas_call(
        functools.partial(_ln_rows_packed_kernel, eps=eps),
        out_shape=jax.ShapeDtypeStruct((Rp, GC), x2.dtype),
        grid_spec=pltpu.PrefetchScalarGridSpec(
            num_scalar_prefetch=0,
            grid=(pl.cdiv(Rp, tr),),
            in_specs=[
                pl.BlockSpec((tr, GC), lambda i: (i, 0)),
                pl.BlockSpec((GC, G), lambda i: (0, 0)),  # resident
                pl.BlockSpec((G, GC), lambda i: (0, 0)),  # resident
                pl.BlockSpec((1, GC), lambda i: (0, 0)),  # resident
                pl.BlockSpec((1, GC), lambda i: (0, 0)),  # resident
            ],
            out_specs=pl.BlockSpec((tr, GC), lambda i: (i, 0)),
        ),
        compiler_params=pltpu.CompilerParams(
            dimension_semantics=("parallel",),
            vmem_limit_bytes=limit),
        cost_estimate=pl.CostEstimate(
            flops=8 * R * C + 8 * Rp * GC * G,
            transcendentals=Rp * G,
            bytes_accessed=2 * R * C * esize),
    )(xp, a_reduce, a_bcast, w_row, b_row)
    return out


@functools.partial(jax.jit, static_argnames=("eps",))
def _layer_norm_channels_last(x, weight, bias, *, eps):
    orig_shape = x.shape
    C = orig_shape[-1]
    R = math.prod(orig_shape[:-1]) if len(orig_shape) > 1 else 1
    x2 = x.reshape(R, C)
    # Lane-dense packing only when the packed row is exactly 128 lanes
    # (GC == 128): that captures the full unmasked-store benefit with the
    # minimum MXU work.  Otherwise use the general path.
    if C < _LANES and _LANES % C == 0:
        G = _LANES // C
        if G > 1 and R % G == 0:
            return _ln_last_packed(x2, weight, bias, eps, G).reshape(orig_shape)
    return _ln_last_general(x2, weight, bias, eps).reshape(orig_shape)


# ---------------------------------------------------------------------------
# channels_first wrapper
# ---------------------------------------------------------------------------
@functools.partial(jax.jit, static_argnames=("eps",))
def _layer_norm_channels_first(x, weight, bias, *, eps):
    N, C = x.shape[0], x.shape[1]
    HW = math.prod(x.shape[2:]) if x.ndim > 2 else 1
    limit = _vmem_limit_bytes()
    esize = jnp.dtype(x.dtype).itemsize
    align = _sublane_align(x.dtype)

    # Preferred layout: (N, C, S, 128) — spatial extent on full (sublane, lane)
    # tiles so small C does not waste sublanes; reduce over C is pure VPU adds.
    min_block = C * align * _LANES * esize
    if HW % _LANES == 0 and HW >= _LANES and min_block <= _target_block_bytes(limit):
        S = HW // _LANES
        x4 = x.reshape(N, C, S, _LANES)
        w4 = weight.astype(jnp.float32).reshape(1, C, 1, 1)
        b4 = bias.astype(jnp.float32).reshape(1, C, 1, 1)
        ts = _pick_tile(S, C * _LANES * esize, limit, align)
        out = pl.pallas_call(
            functools.partial(_ln_cf_lanes_kernel, eps=eps),
            out_shape=jax.ShapeDtypeStruct((N, C, S, _LANES), x.dtype),
            grid_spec=pltpu.PrefetchScalarGridSpec(
                num_scalar_prefetch=0,
                grid=(N, pl.cdiv(S, ts)),
                in_specs=[
                    pl.BlockSpec((1, C, ts, _LANES), lambda n, s: (n, 0, s, 0)),
                    pl.BlockSpec((1, C, 1, 1), lambda n, s: (0, 0, 0, 0)),  # resident
                    pl.BlockSpec((1, C, 1, 1), lambda n, s: (0, 0, 0, 0)),  # resident
                ],
                out_specs=pl.BlockSpec((1, C, ts, _LANES), lambda n, s: (n, 0, s, 0)),
            ),
            compiler_params=pltpu.CompilerParams(
                dimension_semantics=("parallel", "parallel"),
                vmem_limit_bytes=limit),
            cost_estimate=pl.CostEstimate(
                flops=8 * N * C * HW,
                transcendentals=N * HW,
                bytes_accessed=2 * N * C * HW * esize),
        )(x4, w4, b4)
        return out.reshape(x.shape)

    # Fallback: (1, C, th) blocks with C on sublanes (still transpose-free).
    x3 = x.reshape(N, C, HW)
    w3 = weight.astype(jnp.float32).reshape(1, C, 1)
    b3 = bias.astype(jnp.float32).reshape(1, C, 1)
    th = _pick_tile(HW, C * esize, limit, _LANES)
    out = pl.pallas_call(
        functools.partial(_ln_channels_first_kernel, eps=eps),
        out_shape=jax.ShapeDtypeStruct((N, C, HW), x.dtype),
        grid_spec=pltpu.PrefetchScalarGridSpec(
            num_scalar_prefetch=0,
            grid=(N, pl.cdiv(HW, th)),
            in_specs=[
                pl.BlockSpec((1, C, th), lambda n, h: (n, 0, h)),
                pl.BlockSpec((1, C, 1), lambda n, h: (0, 0, 0)),  # resident
                pl.BlockSpec((1, C, 1), lambda n, h: (0, 0, 0)),  # resident
            ],
            out_specs=pl.BlockSpec((1, C, th), lambda n, h: (n, 0, h)),
        ),
        compiler_params=pltpu.CompilerParams(
            dimension_semantics=("parallel", "parallel"),
            vmem_limit_bytes=limit),
        cost_estimate=pl.CostEstimate(
            flops=8 * N * C * HW,
            transcendentals=N * HW,
            bytes_accessed=2 * N * C * HW * esize),
    )(x3, w3, b3)
    return out.reshape(x.shape)


# ---------------------------------------------------------------------------
# Module mirror
# ---------------------------------------------------------------------------
class LayerNormPallas:
    """Mirror of the PyTorch LayerNorm module (channels_last / channels_first)."""

    def __init__(self, normalized_shape, eps=1e-6, data_format="channels_last",
                 weight=None, bias=None):
        if data_format not in ("channels_last", "channels_first"):
            raise NotImplementedError
        self.C = int(normalized_shape)
        # Same init as nn.Parameter(torch.ones/zeros(C)) unless provided.
        self.weight = (jnp.ones((self.C,), jnp.float32) if weight is None
                       else jnp.asarray(weight, jnp.float32))
        self.bias = (jnp.zeros((self.C,), jnp.float32) if bias is None
                     else jnp.asarray(bias, jnp.float32))
        self.eps = float(eps)
        self.data_format = data_format

    def __call__(self, x):
        # Weight/bias prep (reshape/tile/cast) and the packed-path reducer
        # matrices are compiled into the same jitted executable as the
        # pallas_call, so each forward is a single dispatch.
        if self.data_format == "channels_last":
            return _layer_norm_channels_last(x, self.weight, self.bias, eps=self.eps)
        return _layer_norm_channels_first(x, self.weight, self.bias, eps=self.eps)


# ---------------------------------------------------------------------------
# Pure-JAX references (match the PyTorch module)
# ---------------------------------------------------------------------------
def _ref_channels_first(x, w, b, eps):
    u = x.mean(axis=1, keepdims=True)
    s = ((x - u) ** 2).mean(axis=1, keepdims=True)
    xn = (x - u) / jnp.sqrt(s + eps)
    return w[None, :, None, None] * xn + b[None, :, None, None]


def _ref_channels_last(x, w, b, eps):
    u = x.mean(axis=-1, keepdims=True)
    s = ((x - u) ** 2).mean(axis=-1, keepdims=True)
    xn = (x - u) / jnp.sqrt(s + eps)
    return xn * w + b


if __name__ == "__main__":
    key = jax.random.PRNGKey(0)
    k1, k2, k3, k4, k5, k6, k7, k8 = jax.random.split(key, 8)

    # 1) channels_first: NCHW (batch=2, channels=4, 16x16) -> lane-dense 4D path
    x_cf = jax.random.normal(k1, (2, 4, 16, 16), dtype=jnp.float32)
    w_cf = jax.random.normal(k3, (4,), dtype=jnp.float32)
    b_cf = jax.random.normal(k4, (4,), dtype=jnp.float32)
    ln_cf = LayerNormPallas(4, eps=1e-6, data_format="channels_first",
                            weight=w_cf, bias=b_cf)
    y_cf = jax.block_until_ready(ln_cf(x_cf))
    ref_cf = _ref_channels_first(x_cf, w_cf, b_cf, 1e-6)
    assert y_cf.shape == x_cf.shape
    assert jnp.allclose(y_cf, ref_cf, atol=1e-5, rtol=1e-5)

    # 2) channels_last: NHWC (batch=2, 16x16, channels=4) -> packed path (GC=128)
    x_cl = jax.random.normal(k2, (2, 16, 16, 4), dtype=jnp.float32)
    w_cl = jax.random.normal(k5, (4,), dtype=jnp.float32)
    b_cl = jax.random.normal(k6, (4,), dtype=jnp.float32)
    ln_cl = LayerNormPallas(4, eps=1e-6, data_format="channels_last",
                            weight=w_cl, bias=b_cl)
    y_cl = jax.block_until_ready(ln_cl(x_cl))
    ref_cl = _ref_channels_last(x_cl, w_cl, b_cl, 1e-6)
    assert y_cl.shape == x_cl.shape
    assert jnp.allclose(y_cl, ref_cl, atol=1e-5, rtol=1e-5)

    # 3) channels_last with C=48 (does not divide 128) -> general row path
    x_g = jax.random.normal(k7, (4, 8, 48), dtype=jnp.float32)
    w_g = jax.random.normal(k8, (48,), dtype=jnp.float32)
    b_g = jax.random.normal(k3, (48,), dtype=jnp.float32)
    ln_g = LayerNormPallas(48, eps=1e-6, data_format="channels_last",
                           weight=w_g, bias=b_g)
    y_g = jax.block_until_ready(ln_g(x_g))
    ref_g = _ref_channels_last(x_g, w_g, b_g, 1e-6)
    assert y_g.shape == x_g.shape
    assert jnp.allclose(y_g, ref_g, atol=1e-5, rtol=1e-5)

    # 4) bf16 channels_last -> exercises dtype-dependent (16,128) alignment
    x_bf = jax.random.normal(k1, (2, 16, 16, 4), dtype=jnp.float32).astype(jnp.bfloat16)
    ln_bf = LayerNormPallas(4, eps=1e-6, data_format="channels_last",
                            weight=w_cl, bias=b_cl)
    y_bf = jax.block_until_ready(ln_bf(x_bf))
    ref_bf = _ref_channels_last(x_bf.astype(jnp.float32), w_cl, b_cl, 1e-6)
    assert y_bf.shape == x_bf.shape
    assert y_bf.dtype == jnp.bfloat16
    assert jnp.allclose(y_bf.astype(jnp.float32), ref_bf, atol=5e-2, rtol=5e-2)

    print("KERNEL_OK")
</pallas_src>

<mosaic_0001>
module attributes {stable_mosaic.version = 11 : i64} {
  func.func @_ln_cf_lanes_kernel(%arg0: i32, %arg1: i32, %arg2: memref<1x4x2x128xf32, #tpu.memory_space<vmem>>, %arg3: memref<1x4x1x1xf32, #tpu.memory_space<vmem>>, %arg4: memref<1x4x1x1xf32, #tpu.memory_space<vmem>>, %arg5: memref<1x4x2x128xf32, #tpu.memory_space<vmem>>) attributes {dimension_semantics = [#tpu.dimension_semantics<parallel>, #tpu.dimension_semantics<parallel>], iteration_bounds = array<i64: 2, 1>, scalar_prefetch = 0 : i64, scratch_operands = 0 : i64, tpu.core_type = #tpu.core_type<tc>, window_params = [{transform_indices = @transform_0, window_bounds = array<i64: 1, 4, 2, 128>}, {pipeline_mode = #tpu.pipeline_mode<synchronous>, transform_indices = @transform_1, window_bounds = array<i64: 1, 4, 1, 1>}, {pipeline_mode = #tpu.pipeline_mode<synchronous>, transform_indices = @transform_2, window_bounds = array<i64: 1, 4, 1, 1>}, {transform_indices = @transform_3, window_bounds = array<i64: 1, 4, 2, 128>}]} {
    %c0 = arith.constant 0 : index
    %c0_0 = arith.constant 0 : index
    %c0_1 = arith.constant 0 : index
    %c0_2 = arith.constant 0 : index
    %0 = vector.load %arg2[%c0, %c0_0, %c0_1, %c0_2] : memref<1x4x2x128xf32, #tpu.memory_space<vmem>>, vector<1x4x2x128xf32>
    %cst = arith.constant dense<0.000000e+00> : vector<1x2x128xf32>
    %1 = vector.multi_reduction <add>, %0, %cst [1] : vector<1x4x2x128xf32> to vector<1x2x128xf32>
    %2 = vector.shape_cast %1 : vector<1x2x128xf32> to vector<1x1x2x128xf32>
    %cst_3 = arith.constant 4.000000e+00 : f32
    %3 = vector.broadcast %cst_3 : f32 to vector<1x1x2x128xf32>
    %4 = arith.divf %2, %3 : vector<1x1x2x128xf32>
    %5 = vector.broadcast %4 : vector<1x1x2x128xf32> to vector<1x4x2x128xf32>
    %6 = arith.subf %0, %5 : vector<1x4x2x128xf32>
    %7 = arith.mulf %6, %6 : vector<1x4x2x128xf32>
    %cst_4 = arith.constant dense<0.000000e+00> : vector<1x2x128xf32>
    %8 = vector.multi_reduction <add>, %7, %cst_4 [1] : vector<1x4x2x128xf32> to vector<1x2x128xf32>
    %9 = vector.shape_cast %8 : vector<1x2x128xf32> to vector<1x1x2x128xf32>
    %cst_5 = arith.constant 4.000000e+00 : f32
    %10 = vector.broadcast %cst_5 : f32 to vector<1x1x2x128xf32>
    %11 = arith.divf %9, %10 : vector<1x1x2x128xf32>
    %cst_6 = arith.constant 9.99999997E-7 : f32
    %12 = vector.broadcast %cst_6 : f32 to vector<1x1x2x128xf32>
    %13 = arith.addf %11, %12 : vector<1x1x2x128xf32>
    %14 = math.rsqrt %13 : vector<1x1x2x128xf32>
    %15 = vector.broadcast %14 : vector<1x1x2x128xf32> to vector<1x4x2x128xf32>
    %16 = arith.mulf %6, %15 : vector<1x4x2x128xf32>
    %c0_7 = arith.constant 0 : index
    %c0_8 = arith.constant 0 : index
    %c0_9 = arith.constant 0 : index
    %c0_10 = arith.constant 0 : index
    %17 = vector.load %arg3[%c0_7, %c0_8, %c0_9, %c0_10] : memref<1x4x1x1xf32, #tpu.memory_space<vmem>>, vector<1x4x1x1xf32>
    %c0_11 = arith.constant 0 : index
    %c0_12 = arith.constant 0 : index
    %c0_13 = arith.constant 0 : index
    %c0_14 = arith.constant 0 : index
    %18 = vector.load %arg4[%c0_11, %c0_12, %c0_13, %c0_14] : memref<1x4x1x1xf32, #tpu.memory_space<vmem>>, vector<1x4x1x1xf32>
    %19 = vector.broadcast %17 : vector<1x4x1x1xf32> to vector<1x4x2x128xf32>
    %20 = arith.mulf %16, %19 : vector<1x4x2x128xf32>
    %21 = vector.broadcast %18 : vector<1x4x1x1xf32> to vector<1x4x2x128xf32>
    %22 = arith.addf %20, %21 : vector<1x4x2x128xf32>
    %c0_15 = arith.constant 0 : index
    %c0_16 = arith.constant 0 : index
    %c0_17 = arith.constant 0 : index
    %c0_18 = arith.constant 0 : index
    %23 = vector.load %arg5[%c0_15, %c0_16, %c0_17, %c0_18] : memref<1x4x2x128xf32, #tpu.memory_space<vmem>>, vector<1x4x2x128xf32>
    tpu.vector_store %arg5[%c0_15, %c0_16, %c0_17, %c0_18], %22 {strides = array<i32>} : memref<1x4x2x128xf32, #tpu.memory_space<vmem>>, vector<1x4x2x128xf32>,
    return
  }
  func.func @transform_0(%arg0: i32, %arg1: i32) -> (i32, i32, i32, i32) {
    %c0_i32 = arith.constant 0 : i32
    %c0_i32_0 = arith.constant 0 : i32
    %c0_i32_1 = arith.constant 0 : i32
    return %arg0, %c0_i32, %arg1, %c0_i32_0 : i32, i32, i32, i32
  }
  func.func @transform_1(%arg0: i32, %arg1: i32) -> (i32, i32, i32, i32) {
    %c0_i32 = arith.constant 0 : i32
    %c0_i32_0 = arith.constant 0 : i32
    %c0_i32_1 = arith.constant 0 : i32
    %c0_i32_2 = arith.constant 0 : i32
    %c0_i32_3 = arith.constant 0 : i32
    return %c0_i32, %c0_i32_0, %c0_i32_1, %c0_i32_2 : i32, i32, i32, i32
  }
  func.func @transform_2(%arg0: i32, %arg1: i32) -> (i32, i32, i32, i32) {
    %c0_i32 = arith.constant 0 : i32
    %c0_i32_0 = arith.constant 0 : i32
    %c0_i32_1 = arith.constant 0 : i32
    %c0_i32_2 = arith.constant 0 : i32
    %c0_i32_3 = arith.constant 0 : i32
    return %c0_i32, %c0_i32_0, %c0_i32_1, %c0_i32_2 : i32, i32, i32, i32
  }
  func.func @transform_3(%arg0: i32, %arg1: i32) -> (i32, i32, i32, i32) {
    %c0_i32 = arith.constant 0 : i32
    %c0_i32_0 = arith.constant 0 : i32
    %c0_i32_1 = arith.constant 0 : i32
    return %arg0, %c0_i32, %arg1, %c0_i32_0 : i32, i32, i32, i32
  }
}

</mosaic_0001>

<bundles_post_ra>
// kernel: _layer_norm_channels_first.1
= control target key start
LH: loop header
LB: loop body
LE: loop exit
PB: predicated region body
PF: predicated region fallthrough
CT: control target
= control target key end

     0   :  { %s508_s12 = smov 0   ;;  %s510_s13 = smov 0   ;;  %s584_s0 = inlined_call_operand.vmem [shape: f32[2,4,2,128], index: 0, kind: input, shape index: {}]   ;;  %s585_s1 = inlined_call_operand.vmem [shape: f32[1,4,1,1], index: 1, kind: input, shape index: {}]   ;;  %s586_s2 = inlined_call_operand.vmem [shape: f32[1,4,1,1], index: 2, kind: input, shape index: {}]   ;;  %s587_s3 = inlined_call_operand.vmem [shape: f32[2,4,2,128], index: 3, kind: output, shape index: {}]  }
   0x1   :  { %s512_s14 = smov 0  }
   0x2 LB: > { %s25_s15 = sadd.s32 1, %s481_s13  ;;  %p417_p0 = scmp.ge.s32.totalorder %s485_s14, 1  ;;  %s485_s14 = sphi %s512_s14, %s13_s14   ;;  %s481_s13 = sphi %s510_s13, %s589_s13   ;;  %s477_s12 = sphi %s508_s12, %s588_s12  }
   0x3   : > { %p27_p1 = scmp.ge.s32.totalorder %s25_s15, 2  ;;  %p156_p2 = scmp.lt.s32.totalorder %s485_s14, 3 }
   0x5   : > { %s591_s15 = smov (%p27_p1, %s25_s15), 0  ;;  %p157_p3 = pnand %p417_p0, %p156_p2 }
   0x6   : > { %v424_v0 = vld [vmem:[%s585_s1 + $0x2] ss:$0 sm:$0xff] (!%p157_p3)  ;;  %v422_v1 = vld [vmem:[%s585_s1] ss:$0 sm:$0xff] (!%p157_p3)  ;;  %v487_v2 = vmov (!%p157_p3), 0   ;;  %p186_p4 = scmp.lt.s32.totalorder (!%p157_p3), %s477_s12, 1 }
   0x7   : > { %160 = sbr.rel (%p157_p3) target bundleno = 151 (0x97), region = 32  ;;  %460 = vset.pattern.permute.xlu1 (!%p157_p3), %v487_v2  ;;  %459 = vset.pattern.permute.xlu0 (!%p157_p3), %v487_v2  ;;  %v425_v3 = vld [vmem:[%s585_s1 + $0x3] ss:$0 sm:$0xff] (!%p157_p3)  ;;  %v423_v4 = vld [vmem:[%s585_s1 + $0x1] ss:$0 sm:$0xff] (!%p157_p3)  ;;  %vm206_vm0 = vcmask (!%p157_p3), 1041408  }
   0x8   : > { %275 = vperm.xlu1 (!%p157_p3), %460, %v424_v0   ;;  %267 = vperm.xlu0 (!%p157_p3), %459, %v422_v1   ;;  %v427_v5 = vld [vmem:[%s586_s2 + $0x1] ss:$0 sm:$0xff] (!%p157_p3)  ;;  %v426_v6 = vld [vmem:[%s586_s2] ss:$0 sm:$0xff] (!%p157_p3)  ;;  %v429_v7 = vld [vmem:[%s586_s2 + $0x3] ss:$0 sm:$0xff] (!%p157_p3) }
   0x9   : > { %v428_v8 = vld [vmem:[%s586_s2 + $0x2] ss:$0 sm:$0xff] (!%p157_p3) }
   0xc   : > { %279 = vperm.xlu1 (!%p157_p3), %460, %v425_v3   ;;  %271 = vperm.xlu0 (!%p157_p3), %459, %v423_v4  }
   0xe   : > { %s593_s12 = smov (!%p186_p4, %s477_s12), 1 }
   0xf   : > { %s432_s5 = sshll.u32 %s593_s12, 3 }
  0x10   : > { %311 = vperm.xlu1 %460, %v427_v5   ;;  %307 = vperm.xlu0 %459, %v426_v6   ;;  %s193_s8 = scalar_lea.vmem %s584_s0, %s432_s5  ;;  %s201_s11 = scalar_lea.vmem %s587_s3, %s432_s5 }
  0x11   : > { %v202_v9 = vld [vmem:[%s193_s8] sm:$0x3]  ;;  %v203_v10 = vld [vmem:[%s193_s8 + $0x2] sm:$0x3]  ;;  %v204_v13 = vld [vmem:[%s193_s8 + $0x4] sm:$0x3] }
  0x12   : > { %v207_v11 = vsel %vm206_vm0, %v202_v9, 0.0  ;;  %v208_v12 = vsel %vm206_vm0, %v203_v10, 0.0  ;;  %v210_v15 = vsel %vm206_vm0, %v204_v13, 0.0  ;;  %v205_v16 = vld [vmem:[%s193_s8 + $0x6] sm:$0x3] }
  0x13   : > { %v209_v14 = vadd.f32 %v208_v12, %v207_v11  ;;  %v212_v18 = vsel %vm206_vm0, %v205_v16, 0.0 }
  0x14   : > { %319 = vperm.xlu1 %460, %v429_v7   ;;  %315 = vperm.xlu0 %459, %v428_v8  }
  0x15   : > { %v211_v17 = vadd.f32 %v210_v15, %v209_v14 }
  0x17   : > { %v213_v19 = vadd.f32 %v212_v18, %v211_v17 }
  0x19   : > { %v215_v20 = vmul.f32 0.25, %v213_v19 }
  0x1b   : > { %v216_v21 = vsub.f32 %v202_v9, %v215_v20  ;;  %v217_v22 = vsub.f32 %v203_v10, %v215_v20  ;;  %v218_v23 = vsub.f32 %v204_v13, %v215_v20  ;;  %v219_v26 = vsub.f32 %v205_v16, %v215_v20 }
  0x1d   : > { %v220_v24 = vmul.f32 %v216_v21, %v216_v21  ;;  %v221_v25 = vmul.f32 %v217_v22, %v217_v22  ;;  %v222_v27 = vmul.f32 %v218_v23, %v218_v23  ;;  %v223_v31 = vmul.f32 %v219_v26, %v219_v26 }
  0x1f   : > { %v224_v28 = vsel %vm206_vm0, %v220_v24, 0.0  ;;  %v225_v29 = vsel %vm206_vm0, %v221_v25, 0.0  ;;  %v227_v32 = vsel %vm206_vm0, %v222_v27, 0.0  ;;  %v229_v34 = vsel %vm206_vm0, %v223_v31, 0.0 }
  0x20   : > { %v226_v30 = vadd.f32 %v225_v29, %v224_v28 }
  0x22   : > { %v228_v33 = vadd.f32 %v227_v32, %v226_v30 }
  0x24   : > { %v230_v35 = vadd.f32 %v229_v34, %v228_v33 }
  0x26   : > { %v231_v36 = vmul.f32 0.25, %v230_v35 }
  0x28   : > { %v232_v37 = vadd.f32 1e-06, %v231_v36 }
  0x2a   : > { %461 = vrsqrt.f32 %v232_v37 }
  0x34   : > { %v462_v38 = vpop.eup %461 }
  0x35   : > { %v234_v41 = vmul.f32 %v462_v38, %v216_v21  ;;  %v235_v42 = vmul.f32 %v462_v38, %v217_v22  ;;  %v236_v45 = vmul.f32 %v462_v38, %v218_v23  ;;  %v237_v47 = vmul.f32 %v462_v38, %v219_v26 }
  0x87   : > { %v276_v39 = vpop.permute.xlu1 %275  ;;  %v268_v40 = vpop.permute.xlu0 %267 }
  0x88   : > { %v282_v46 = vmul.f32 %v268_v40, %v234_v41  ;;  %v284_v53 = vmul.f32 %v276_v39, %v236_v45 }
  0x8b   : > { %v280_v43 = vpop.permute.xlu1 %279  ;;  %v272_v44 = vpop.permute.xlu0 %271 }
  0x8c   : > { %v283_v48 = vmul.f32 %v272_v44, %v235_v42  ;;  %v285_v54 = vmul.f32 %v280_v43, %v237_v47 }
  0x8f   : > { %v312_v49 = vpop.permute.xlu1 %311  ;;  %v308_v50 = vpop.permute.xlu0 %307 }
  0x90   : > { %v323_v51 = vadd.f32 %v312_v49, %v283_v48  ;;  %v322_v52 = vadd.f32 %v308_v50, %v282_v46 }
  0x92   : > { %327 = vst [vmem:[%s201_s11 + $0x2] sm:$0x3] %v323_v51  ;;  %326 = vst [vmem:[%s201_s11] sm:$0x3] %v322_v52 }
  0x93   : > { %v320_v55 = vpop.permute.xlu1 %319  ;;  %v316_v56 = vpop.permute.xlu0 %315 }
  0x94   : > { %v325_v57 = vadd.f32 %v320_v55, %v285_v54  ;;  %v324_v58 = vadd.f32 %v316_v56, %v284_v53 }
  0x96   : > { %329 = vst [vmem:[%s201_s11 + $0x6] sm:$0x3] %v325_v57  ;;  %328 = vst [vmem:[%s201_s11 + $0x4] sm:$0x3] %v324_v58 }
  0x97 PF: > { %s13_s14 = sadd.s32 1, %s485_s14   ;;  %s588_s12 = smov %s481_s13 }
  0x98   : > { %p10_p5 = scmp.ge.s32.totalorder %s13_s14, 4   ;;  %s589_s13 = smov %s591_s15 }
  0x9a   :  { %12 = sbr.rel (!%p10_p5) target bundleno = 2 (0x2), region = 62 }

</bundles_post_ra>
